<compile_context>
chip_gen: v6e
topology: v6e:2x2x1
jax: 0.10.0
libtpu: 0.0.40
codegen_flags: <defaults>
</compile_context>

<pallas_src>
import jax
import jax.numpy as jnp
from jax.experimental import pallas as pl
from jax.experimental.pallas import tpu as pltpu


def _masked_avg_pool_kernel(len_ref, x_ref, o_ref, acc_ref):
    """One (Bt, Sc, L) tile of x; accumulates over the seq-chunk grid axis.

    len_ref: (Bt, 1)  int32 VMEM  -- valid lengths for this batch tile
    x_ref:   (Bt, Sc, L)    VMEM  -- input tile (native dtype)
    o_ref:   (Bt, L)        VMEM  -- output tile (written on last seq chunk)
    acc_ref: (Bt, L)  f32   VMEM  -- scratch accumulator, resident across chunks
    """
    s_idx = pl.program_id(1)
    bt, sc, _ = x_ref.shape

    @pl.when(s_idx == 0)
    def _init():
        acc_ref[...] = jnp.zeros_like(acc_ref)

    lengths = len_ref[...]                                              # (Bt, 1) int32
    # Absolute sequence positions covered by this chunk, kept at (Bt, Sc, 1) so
    # the mask is a cheap lane-broadcast select (no full-size iota materialized).
    # Positions in the padded tail (>= S) always exceed lengths, so padding is
    # masked out automatically when S % Sc != 0.
    pos = jax.lax.broadcasted_iota(jnp.int32, (bt, sc, 1), 1) + s_idx * sc
    mask = pos < lengths[:, :, None]                                    # (Bt, Sc, 1) bool

    x = x_ref[...].astype(jnp.float32)                                  # f32 accumulation
    acc_ref[...] += jnp.sum(jnp.where(mask, x, 0.0), axis=1)            # (Bt, L)

    @pl.when(s_idx == pl.num_programs(1) - 1)
    def _finalize():
        # Exact reciprocal (approx=False) to match the reference divide closely.
        inv_len = pl.reciprocal(lengths.astype(jnp.float32), approx=False)   # (Bt, 1)
        o_ref[...] = (acc_ref[...] * inv_len).astype(o_ref.dtype)


def _choose_tiles(B, S, L, itemsize, budget_bytes=8 * 1024 * 1024):
    """Pick (Bt, Sc) so one x input tile stays under ~budget_bytes.

    ~8 MiB per input buffer keeps (2 double-buffered input tiles + output +
    accumulator) well inside v7x's 32 MiB scoped VMEM and v5e's 16 MiB default,
    while staying far above the tile size needed to sit on the HBM roofline.

    Preference order:
      1. full-sequence batch slabs (reduction grid of length 1, no revisits),
      2. otherwise 8-row batch tiles with the sequence axis chunked.

    Block-shape constraints honored:
      * output / lengths blocks (Bt, ...): Bt is a multiple of 8 or equals B.
      * x block (Bt, Sc, L): Sc is a multiple of 8 or equals S; L is full.
    """
    row_bytes = max(1, S * L * itemsize)
    if B <= 8:
        bt = B
    else:
        # Largest multiple-of-8 batch tile whose full-sequence slab fits budget
        # (capped at B); falls back to 8 when even one full-seq row is too big.
        bt = min(B, max(8, (budget_bytes // row_bytes) // 8 * 8))
    sc = budget_bytes // max(1, bt * L * itemsize)
    if sc >= S:
        sc = S
    else:
        sc = min(max(8, (sc // 8) * 8), S)
    return bt, sc


def custom_average_pooling(x, lengths, *, block_b=None, block_s=None):
    """x: (B, S, L) float array, lengths: (B,) int -> (B, L) in x.dtype."""
    B, S, L = x.shape
    itemsize = jnp.dtype(x.dtype).itemsize
    bt, sc = _choose_tiles(B, S, L, itemsize)
    if block_b is not None:
        bt = block_b
    if block_s is not None:
        sc = block_s

    lengths_i32 = lengths.astype(jnp.int32).reshape(B, 1)
    grid = (pl.cdiv(B, bt), pl.cdiv(S, sc))          # reduction (seq) axis last

    cost = pl.CostEstimate(
        flops=2 * B * S * L + B * L,
        transcendentals=0,
        bytes_accessed=B * S * L * itemsize + B * 4 + B * L * itemsize,
    )

    return pl.pallas_call(
        _masked_avg_pool_kernel,
        out_shape=jax.ShapeDtypeStruct((B, L), x.dtype),
        grid_spec=pltpu.PrefetchScalarGridSpec(
            num_scalar_prefetch=0,
            grid=grid,
            in_specs=[
                pl.BlockSpec((bt, 1), lambda b, s: (b, 0)),         # lengths
                pl.BlockSpec((bt, sc, L), lambda b, s: (b, s, 0)),  # x tile
            ],
            out_specs=pl.BlockSpec((bt, L), lambda b, s: (b, 0)),   # resident over s
            scratch_shapes=[pltpu.VMEM((bt, L), jnp.float32)],
        ),
        compiler_params=pltpu.CompilerParams(
            # Batch tiles are independent -> shard across v7x's two TensorCores;
            # the seq-chunk axis carries the accumulator -> "arbitrary".
            dimension_semantics=("parallel", "arbitrary"),
        ),
        cost_estimate=cost,
    )(lengths_i32, x)


def _reference(x, lengths):
    B, S, L = x.shape
    mask = (jnp.arange(S)[None, :] < lengths[:, None]).astype(jnp.float32)   # (B, S)
    valid_sum = jnp.sum(x.astype(jnp.float32) * mask[:, :, None], axis=1)
    return valid_sum / lengths[:, None].astype(jnp.float32)


if __name__ == "__main__":
    key = jax.random.PRNGKey(0)
    kx, kl, kx2, kl2 = jax.random.split(key, 4)

    # Small shapes matching the module's (batch, seq_count, seq_len) convention.
    B, S, L = 2, 8, 32
    x = jax.random.normal(kx, (B, S, L), dtype=jnp.float32)
    lengths = jax.random.randint(kl, (B,), minval=1, maxval=S + 1, dtype=jnp.int32)

    out = jax.block_until_ready(custom_average_pooling(x, lengths))
    ref = _reference(x, lengths)
    assert out.shape == (B, L) and out.dtype == x.dtype
    assert jnp.allclose(out, ref, atol=1e-5, rtol=1e-5)

    # Second check exercising the tiled/accumulating path:
    # batch tiles of 8 (2 blocks) and seq chunks of 8 (3 chunks, accumulator path).
    B2, S2, L2 = 16, 24, 128
    x2 = jax.random.normal(kx2, (B2, S2, L2), dtype=jnp.float32)
    lengths2 = jax.random.randint(kl2, (B2,), minval=1, maxval=S2 + 1, dtype=jnp.int32)
    out2 = jax.block_until_ready(
        custom_average_pooling(x2, lengths2, block_b=8, block_s=8))
    ref2 = _reference(x2, lengths2)
    assert jnp.allclose(out2, ref2, atol=1e-5, rtol=1e-5)

    # Third check exercising the auto-chosen full-sequence batch-slab path.
    B3, S3, L3 = 32, 16, 256
    x3 = jax.random.normal(kx, (B3, S3, L3), dtype=jnp.bfloat16)
    lengths3 = jax.random.randint(kl, (B3,), minval=1, maxval=S3 + 1, dtype=jnp.int32)
    out3 = jax.block_until_ready(custom_average_pooling(x3, lengths3))
    ref3 = _reference(x3.astype(jnp.float32), lengths3)
    assert out3.dtype == jnp.bfloat16
    assert jnp.allclose(out3.astype(jnp.float32), ref3, atol=2e-2, rtol=2e-2)

    print("KERNEL_OK")
</pallas_src>

<mosaic_0001>
module attributes {stable_mosaic.version = 11 : i64} {
  func.func @_masked_avg_pool_kernel(%arg0: i32, %arg1: i32, %arg2: memref<2x1xi32, #tpu.memory_space<vmem>>, %arg3: memref<2x8x32xf32, #tpu.memory_space<vmem>>, %arg4: memref<2x32xf32, #tpu.memory_space<vmem>>, %arg5: memref<2x32xf32, #tpu.memory_space<vmem>>) attributes {dimension_semantics = [#tpu.dimension_semantics<parallel>, #tpu.dimension_semantics<arbitrary>], iteration_bounds = array<i64: 1, 1>, scalar_prefetch = 0 : i64, scratch_operands = 1 : i64, tpu.core_type = #tpu.core_type<tc>, window_params = [{transform_indices = @transform_0, window_bounds = array<i64: 2, 1>}, {transform_indices = @transform_1, window_bounds = array<i64: 2, 8, 32>}, {transform_indices = @transform_2, window_bounds = array<i64: 2, 32>}]} {
    %c0_i32 = arith.constant 0 : i32
    %0 = arith.cmpi eq, %arg1, %c0_i32 : i32
    %1 = arith.extui %0 : i1 to i32
    %c0_i32_0 = arith.constant 0 : i32
    %2 = arith.cmpi ne, %1, %c0_i32_0 : i32
    scf.if %2 {
      %cst_12 = arith.constant 0.000000e+00 : f32
      %23 = vector.broadcast %cst_12 : f32 to vector<2x32xf32>
      %c0_13 = arith.constant 0 : index
      %c0_14 = arith.constant 0 : index
      %24 = vector.load %arg5[%c0_13, %c0_14] : memref<2x32xf32, #tpu.memory_space<vmem>>, vector<2x32xf32>
      tpu.vector_store %arg5[%c0_13, %c0_14], %23 {strides = array<i32>} : memref<2x32xf32, #tpu.memory_space<vmem>>, vector<2x32xf32>,
    } else {
    }
    %c0 = arith.constant 0 : index
    %c0_1 = arith.constant 0 : index
    %3 = vector.load %arg2[%c0, %c0_1] : memref<2x1xi32, #tpu.memory_space<vmem>>, vector<2x1xi32>
    %4 = tpu.iota {dimensions = array<i32: 1>} : vector<2x8x1xi32>
    %c8_i32 = arith.constant 8 : i32
    %5 = arith.muli %arg1, %c8_i32 : i32
    %6 = vector.broadcast %5 : i32 to vector<2x8x1xi32>
    %7 = arith.addi %4, %6 : vector<2x8x1xi32>
    %8 = vector.shape_cast %3 : vector<2x1xi32> to vector<2x1x1xi32>
    %9 = vector.broadcast %8 : vector<2x1x1xi32> to vector<2x8x1xi32>
    %10 = arith.cmpi slt, %7, %9 : vector<2x8x1xi32>
    %c0_2 = arith.constant 0 : index
    %c0_3 = arith.constant 0 : index
    %c0_4 = arith.constant 0 : index
    %11 = vector.load %arg3[%c0_2, %c0_3, %c0_4] : memref<2x8x32xf32, #tpu.memory_space<vmem>>, vector<2x8x32xf32>
    %c0_5 = arith.constant 0 : index
    %c0_6 = arith.constant 0 : index
    %12 = vector.load %arg5[%c0_5, %c0_6] : memref<2x32xf32, #tpu.memory_space<vmem>>, vector<2x32xf32>
    %cst = arith.constant 0.000000e+00 : f32
    %13 = vector.shape_cast %10 : vector<2x8x1xi1> to vector<2x8x1xi1>
    %14 = vector.broadcast %13 : vector<2x8x1xi1> to vector<2x8x32xi1>
    %15 = vector.broadcast %cst : f32 to vector<2x8x32xf32>
    %16 = arith.select %14, %11, %15 : vector<2x8x32xi1>, vector<2x8x32xf32>
    %cst_7 = arith.constant dense<0.000000e+00> : vector<2x32xf32>
    %17 = vector.multi_reduction <add>, %16, %cst_7 [1] : vector<2x8x32xf32> to vector<2x32xf32>
    %18 = arith.addf %12, %17 : vector<2x32xf32>
    %c0_8 = arith.constant 0 : index
    %c0_9 = arith.constant 0 : index
    %19 = vector.load %arg5[%c0_8, %c0_9] : memref<2x32xf32, #tpu.memory_space<vmem>>, vector<2x32xf32>
    tpu.vector_store %arg5[%c0_8, %c0_9], %18 {strides = array<i32>} : memref<2x32xf32, #tpu.memory_space<vmem>>, vector<2x32xf32>,
    %c0_i32_10 = arith.constant 0 : i32
    %20 = arith.cmpi eq, %arg1, %c0_i32_10 : i32
    %21 = arith.extui %20 : i1 to i32
    %c0_i32_11 = arith.constant 0 : i32
    %22 = arith.cmpi ne, %21, %c0_i32_11 : i32
    scf.if %22 {
      %23 = arith.sitofp %3 : vector<2x1xi32> to vector<2x1xf32>
      %24 = tpu.reciprocal %23 : vector<2x1xf32> -> vector<2x1xf32>
      %c0_12 = arith.constant 0 : index
      %c0_13 = arith.constant 0 : index
      %25 = vector.load %arg5[%c0_12, %c0_13] : memref<2x32xf32, #tpu.memory_space<vmem>>, vector<2x32xf32>
      %26 = vector.broadcast %24 : vector<2x1xf32> to vector<2x32xf32>
      %27 = arith.mulf %25, %26 : vector<2x32xf32>
      %c0_14 = arith.constant 0 : index
      %c0_15 = arith.constant 0 : index
      %28 = vector.load %arg4[%c0_14, %c0_15] : memref<2x32xf32, #tpu.memory_space<vmem>>, vector<2x32xf32>
      tpu.vector_store %arg4[%c0_14, %c0_15], %27 {strides = array<i32>} : memref<2x32xf32, #tpu.memory_space<vmem>>, vector<2x32xf32>,
    } else {
    }
    return
  }
  func.func @transform_0(%arg0: i32, %arg1: i32) -> (i32, i32) {
    %c0_i32 = arith.constant 0 : i32
    %c0_i32_0 = arith.constant 0 : i32
    return %arg0, %c0_i32 : i32, i32
  }
  func.func @transform_1(%arg0: i32, %arg1: i32) -> (i32, i32, i32) {
    %c0_i32 = arith.constant 0 : i32
    %c0_i32_0 = arith.constant 0 : i32
    return %arg0, %arg1, %c0_i32 : i32, i32, i32
  }
  func.func @transform_2(%arg0: i32, %arg1: i32) -> (i32, i32) {
    %c0_i32 = arith.constant 0 : i32
    %c0_i32_0 = arith.constant 0 : i32
    return %arg0, %c0_i32 : i32, i32
  }
}

</mosaic_0001>

<bundles_post_ra>
// kernel: tpu_custom_call.1
= control target key start
LH: loop header
LB: loop body
LE: loop exit
PB: predicated region body
PF: predicated region fallthrough
CT: control target
= control target key end

     0   :  { %7 = vsyncpa [#allocation4], 0  ;;  %s225_s0 = inlined_call_operand.vmem [shape: s32[2,1], index: 0, kind: input, shape index: {}]   ;;  %s226_s1 = inlined_call_operand.hbm [shape: f32[2,8,32], index: 1, kind: input, shape index: {}]   ;;  %s227_s2 = inlined_call_operand.hbm [shape: f32[2,32], index: 2, kind: output, shape index: {}]  }
   0x1   :  { %8 = vsyncpa [#allocation5], 0  ;;  %s191_s9 = smov [#allocation3]  }
   0x2   :  { %s16_s10 = sshll.u32 %s191_s9, 4  ;;  %s17_s10 = int_to_ptr.vmem [resolvable:$true] %s16_s10 }
   0x3   :  { %s155_s11 = scalar_lea.vmem %s17_s10, 256  ;;  %p160_p1 = scmp.lt.s32.totalorder %s17_s10, %s17_s10 }
   0x4   :  { %p156_p0 = scmp.ne.s32.totalorder %s17_s10, %s155_s11  ;;  %p161_p2 = scmp.lt.s32.totalorder %s155_s11, %s155_s11 }
   0x6   :  { %p162_p3 = por %p161_p2, %p160_p1 }
   0x8   :  { %p163_p4 = pnand %p162_p3, %p156_p0 }
   0xa   :  { %166 = shalt.err (!%p163_p4)
}
   0xb   :  { %s192_s12 = smov 128   ;;  %s193_s13 = smov 8  }
   0xc   :  { %22 = dma.hbm_to_vmem [thread:$0]  %s226_s1, 256, %s17_s10, [#allocation4], %s192_s12, %s192_s12, %s193_s13  }
   0xd   :  { %187 = dma.done.wait [#allocation4], 256  }
   0xe   :  { %188 = vsyncadd [#allocation4], 4294967040  ;;  %v33_v0 = vlaneseq  ;;  %v194_v1 = vmov 0   ;;  %v195_v2 = vmov 1966171168   ;;  %vm30_vm2 = vcmask 254976  }
   0xf   :  { %143 = vset.pattern.permute.xlu0 %v194_v1  ;;  %v39_v3 = vunpack.c.l.s4 %v195_v2  ;;  %144 = vset.pattern.permute.xlu1 %v194_v1  ;;  %v32_v7 = vld [vmem:[%s225_s0] sm:$0x3]  ;;  %v196_v19 = vmov 0.0   ;;  %v70_v20 = vld [vmem:[#allocation3] sm:$0xff]  ;;  %vm85_vm3 = vcmask 261120   ;;  %v71_v24 = vld [vmem:[#allocation3 + $0x8] sm:$0xff] }
  0x10   :  { %v34_v4 = vshrl.u32 %v33_v0, 7  ;;  %v111_v10 = vcvt.s32.f32 %v32_v7  ;;  %31 = vst.msk [vmem:[#allocation2] sm:$0x3] %vm30_vm2, %v196_v19  ;;  %vm102_vm6 = vcmask 1041409   ;;  %s197_s0 = smov [#allocation6]  }
  0x11   :  { %v40_v5 = vunpack.c.0.s8 %v39_v3  ;;  %s127_s1 = sshll.u32 %s197_s0, 4  ;;  %s128_s1 = int_to_ptr.vmem [resolvable:$true] %s127_s1 }
  0x12   :  { %v62_v9 = vsub.s32 0, %v34_v4  ;;  %145 = vrcp.f32 %v111_v10  ;;  %s167_s18 = scalar_lea.vmem %s128_s1, 32  ;;  %p172_p6 = scmp.lt.s32.totalorder %s128_s1, %s128_s1 }
  0x13   :  { %v43_v6 = vsub.s32 %v40_v5, %v34_v4  ;;  %p168_p5 = scmp.ne.s32.totalorder %s128_s1, %s167_s18  ;;  %p173_p7 = scmp.lt.s32.totalorder %s167_s18, %s167_s18 }
  0x15   :  { %v44_v8 = vrot.slane %v32_v7, %v43_v6  ;;  %p174_p8 = por %p173_p7, %p172_p6 }
  0x17   :  { %v52_v11 = vrot.slane %v44_v8, %v43_v6  ;;  %v45_v12 = vcombine.high %v44_v8, %v44_v8  ;;  %v72_v40 = vld [vmem:[#allocation2] sm:$0x3]  ;;  %p175_p9 = pnand %p174_p8, %p168_p5 }
  0x19   :  { %v63_v13 = vrot.slane %v52_v11, %v62_v9  ;;  %v59_v14 = vrot.slane %v45_v12, %v43_v6 }
  0x1b   :  { %vm68_vm0 = vcmp.lt.s32.totalorder %v34_v4, %v63_v13  ;;  %v67_v15 = vrot.slane %v59_v14, %v62_v9 }
  0x1c   :  { %v73_v16 = vsel %vm68_vm0, 1, %v194_v1 }
  0x1d   :  { %76 = vperm.xlu0 %143, %v73_v16   ;;  %vm69_vm1 = vcmp.lt.s32.totalorder %v34_v4, %v67_v15 }
  0x1e   :  { %v74_v17 = vsel %vm69_vm1, 1, %v194_v1 }
  0x1f   :  { %v146_v18 = vpop.eup %145 }
  0x20   :  { %116 = vperm.xlu1 %144, %v146_v18  }
  0x21   :  { %79 = vperm.xlu0 %143, %v74_v17  }
  0x98   :  { %v77_v21 = vpop.permute.xlu0 %76 }
  0x99   :  { %vm81_vm4 = vcmp.eq.s32.totalorder %v77_v21, 1 }
  0x9a   :  { %v83_v22 = vsel %vm81_vm4, %v70_v20, 0.0 }
  0x9b   :  { %v86_v23 = vsel %vm85_vm3, %v83_v22, 0.0  ;;  %v117_v43 = vpop.permute.xlu1 %116 }
  0x9c   :  { %v87_v25 = vrot.slane %v86_v23, 4  ;;  %v80_v26 = vpop.permute.xlu0 %79 }
  0x9d   :  { %vm82_vm5 = vcmp.eq.s32.totalorder %v80_v26, 1 }
  0x9e   :  { %v88_v27 = vadd.f32 %v87_v25, %v86_v23  ;;  %v84_v28 = vsel %vm82_vm5, %v71_v24, 0.0 }
  0x9f   :  { %v93_v29 = vsel %vm85_vm3, %v84_v28, 0.0 }
  0xa0   :  { %v89_v30 = vrot.slane %v88_v27, 2  ;;  %v94_v31 = vrot.slane %v93_v29, 4 }
  0xa2   :  { %v90_v32 = vadd.f32 %v89_v30, %v88_v27  ;;  %v95_v33 = vadd.f32 %v94_v31, %v93_v29 }
  0xa4   :  { %v96_v34 = vrot.slane %v95_v33, 2  ;;  %v91_v35 = vrot.slane %v90_v32, 1 }
  0xa6   :  { %v97_v36 = vadd.f32 %v96_v34, %v95_v33  ;;  %v92_v38 = vadd.f32 %v91_v35, %v90_v32 }
  0xa8   :  { %v98_v37 = vrot.slane %v97_v36, 1 }
  0xaa   :  { %v99_v39 = vadd.f32 %v98_v37, %v97_v36 }
  0xac   :  { %v103_v41 = vsel %vm102_vm6, %v99_v39, %v92_v38 }
  0xad   :  { %v105_v42 = vadd.f32 %v103_v41, %v72_v40 }
  0xaf   :  { %107 = vst.msk [vmem:[#allocation2] sm:$0x3] %vm30_vm2, %v105_v42 }
  0xb6   :  { %v113_v44 = vld [vmem:[#allocation2] sm:$0x3] }
  0xb7   :  { %v119_v45 = vmul.f32 %v117_v43, %v113_v44 }
  0xb9   :  { %120 = vst.msk [vmem:[#allocation6] sm:$0x3] %vm30_vm2, %v119_v45 }
  0xba   :  { %178 = shalt.err (!%p175_p9)
}
  0xbb   :  { %130 = dma.vmem_to_hbm [thread:$0]  %s128_s1, 32, %s227_s2, [#allocation5]  }
  0xbc   :  { %189 = dma.done.wait [#allocation5], 32  }
  0xbd   :  { %190 = vsyncadd [#allocation5], 4294967264 }
  0xbe   :  { %134 = vsyncpa [#allocation4], 1 }
  0xbf   :  { %135 = vsyncpa [#allocation5], 1 }

</bundles_post_ra>
